<compile_context>
chip_gen: v5e
topology: v5e:2x2
jax: 0.10.0
libtpu: 0.0.40
codegen_flags: <defaults>
</compile_context>

<pallas_src>
import functools

import jax
import jax.numpy as jnp
import numpy as np
from jax.experimental import pallas as pl
from jax.experimental.pallas import tpu as pltpu


# ---------------------------------------------------------------------------
# Fused kernel: gate MLP (tiny, hidden under DMA) + lane-dense gated stream.
# ---------------------------------------------------------------------------
def _gate_vector(ctx, w1, b1, w2, b2, lane_repeat):
    """(1, E) ctx -> (1, F*lane_repeat) gate = sigmoid(relu(ctx@w1+b1)@w2+b2)*2."""
    inp = jnp.broadcast_to(ctx, (8, ctx.shape[-1]))                   # (8, E) MXU-friendly
    h = jnp.dot(inp, w1, preferred_element_type=jnp.float32) + b1     # (8, H)
    h = jnp.maximum(h, 0.0)                                           # ReLU
    o = jnp.dot(h, w2, preferred_element_type=jnp.float32) + b2       # (8, F)
    g = jax.nn.sigmoid(o[0:1, :]) * 2.0                               # (1, F)
    if lane_repeat > 1:
        # Tile along lanes so the gate matches the lane-dense packed width W.
        g = jnp.concatenate([g] * lane_repeat, axis=1)                # (1, W)
    return g


def fused_feature_selection_kernel(ctx1_ref, w11_ref, b11_ref, w12_ref, b12_ref,
                                   ctx2_ref, w21_ref, b21_ref, w22_ref, b22_ref,
                                   x_ref, o1_ref, o2_ref, *, lane_repeat):
    g1 = _gate_vector(ctx1_ref[...], w11_ref[...], b11_ref[...],
                      w12_ref[...], b12_ref[...], lane_repeat)
    g2 = _gate_vector(ctx2_ref[...], w21_ref[...], b21_ref[...],
                      w22_ref[...], b22_ref[...], lane_repeat)
    x = x_ref[...]                                                    # (row_tile, W)
    o1_ref[...] = (x * g1).astype(o1_ref.dtype)
    o2_ref[...] = (x * g2).astype(o2_ref.dtype)


# ---------------------------------------------------------------------------
# Wrapper
# ---------------------------------------------------------------------------
def feature_selection(flat_emb, params, *, target_block_bytes=4 << 20):
    """flat_emb: (B, L, F).  Returns (feature1, feature2), each (B, L, F)."""
    (ctx1, w11, b11, w12, b12, ctx2, w21, b21, w22, b22) = params
    B, L, F = flat_emb.shape
    N = B * L
    dtype = flat_emb.dtype
    itemsize = jnp.dtype(dtype).itemsize

    # Lane-dense repacking: pack g = 128 // F rows into one 128-lane row when
    # that is a pure reshape (no padding copies).
    if F % 128 == 0:
        g = 1
    elif 128 % F == 0 and N % (128 // F) == 0:
        g = 128 // F
    else:
        g = 1
        # TODO(synk): for F neither dividing nor divisible by 128, pad F up to a
        # lane-dense multiple of 128 inside the packing step to avoid masked
        # vst.msk partial stores (only matters if production F hits this case).
    W = g * F
    Ng = N // g
    x = flat_emb.reshape(Ng, W)            # layout plumbing only; no pad/concat

    # Row-tile selection: ~target_block_bytes per streaming array, 8-aligned;
    # full extent when the whole array is smaller than one block.
    rt = max(8, (target_block_bytes // (W * itemsize)) // 8 * 8)
    if rt >= Ng:
        rt = Ng                             # full first dim -> always legal
    grid = (pl.cdiv(Ng, rt),)               # partial last block masked by Pallas

    rows_spec = pl.BlockSpec((rt, W), lambda i: (i, 0))

    def const_spec(p):                       # whole small tensor, resident in VMEM
        return pl.BlockSpec(p.shape, lambda i: (0,) * p.ndim)

    # VMEM budget: 6 live streaming buffers (1 in + 2 out, double buffered)
    # + small params + slack; clamp so it fits v7x's 64 MiB physical VMEM.
    block_bytes = rt * W * itemsize
    vmem_limit = max(32 << 20, min(6 * block_bytes + (8 << 20), 56 << 20))

    out1, out2 = pl.pallas_call(
        functools.partial(fused_feature_selection_kernel, lane_repeat=g),
        out_shape=(jax.ShapeDtypeStruct((Ng, W), dtype),
                   jax.ShapeDtypeStruct((Ng, W), dtype)),
        grid=grid,
        in_specs=[const_spec(ctx1), const_spec(w11), const_spec(b11),
                  const_spec(w12), const_spec(b12),
                  const_spec(ctx2), const_spec(w21), const_spec(b21),
                  const_spec(w22), const_spec(b22),
                  rows_spec],
        out_specs=(rows_spec, rows_spec),
        compiler_params=pltpu.CompilerParams(
            # Every grid step is fully independent (gates recomputed per step),
            # so this axis may also be split across TensorCores on v7x
            # (CORE_PARALLEL) without any first-step init hazard.
            dimension_semantics=("parallel",),
            vmem_limit_bytes=int(vmem_limit)),
    )(ctx1, w11, b11, w12, b12, ctx2, w21, b21, w22, b22, x)

    return out1.reshape(B, L, F), out2.reshape(B, L, F)


# ---------------------------------------------------------------------------
# Synthetic parameters + pure-JAX reference (matches the PyTorch module).
# ---------------------------------------------------------------------------
def init_params(key, embedding_dim, hidden_dim, feature_dim):
    """ctx biases are zeros, as in nn.Parameter(torch.zeros(1, embedding_dim))."""
    ks = jax.random.split(key, 8)

    def lin(kw, kb, din, dout):
        w = jax.random.normal(kw, (din, dout), jnp.float32) * 0.1
        b = jax.random.normal(kb, (1, dout), jnp.float32) * 0.1
        return w, b

    ctx1 = jnp.zeros((1, embedding_dim), jnp.float32)
    ctx2 = jnp.zeros((1, embedding_dim), jnp.float32)
    w11, b11 = lin(ks[0], ks[1], embedding_dim, hidden_dim)
    w12, b12 = lin(ks[2], ks[3], hidden_dim, feature_dim)
    w21, b21 = lin(ks[4], ks[5], embedding_dim, hidden_dim)
    w22, b22 = lin(ks[6], ks[7], hidden_dim, feature_dim)
    return (ctx1, w11, b11, w12, b12, ctx2, w21, b21, w22, b22)


def reference(flat_emb, params):
    (ctx1, w11, b11, w12, b12, ctx2, w21, b21, w22, b22) = params
    B, L, F = flat_emb.shape

    def gate(ctx, w1, b1, w2, b2):
        inp = jnp.broadcast_to(ctx[None, :, :], (B, L, ctx.shape[-1]))
        h = jnp.maximum(inp @ w1 + b1, 0.0)
        return jax.nn.sigmoid(h @ w2 + b2) * 2.0

    return (flat_emb * gate(ctx1, w11, b11, w12, b12),
            flat_emb * gate(ctx2, w21, b21, w22, b22))


if __name__ == "__main__":
    # Small shapes consistent with the module: batch=2, num_fields (seq)=8,
    # feature_dim=32, embedding_dim=16, fs_hidden_units=[32].
    B, L = 2, 8
    feature_dim = 32
    embedding_dim = 16
    hidden_dim = 32

    key = jax.random.PRNGKey(0)
    k_emb, k_par = jax.random.split(key)
    flat_emb = jax.random.normal(k_emb, (B, L, feature_dim), jnp.float32)
    params = init_params(k_par, embedding_dim, hidden_dim, feature_dim)

    f1, f2 = feature_selection(flat_emb, params)
    jax.block_until_ready((f1, f2))

    r1, r2 = reference(flat_emb, params)
    np.testing.assert_allclose(np.asarray(f1), np.asarray(r1), rtol=1e-5, atol=1e-5)
    np.testing.assert_allclose(np.asarray(f2), np.asarray(r2), rtol=1e-5, atol=1e-5)

    print("KERNEL_OK")
</pallas_src>

<mosaic_0001>
module attributes {stable_mosaic.version = 11 : i64} {
  func.func @fused_feature_selection_kernel(%arg0: i32, %arg1: memref<1x16xf32, #tpu.memory_space<vmem>>, %arg2: memref<16x32xf32, #tpu.memory_space<vmem>>, %arg3: memref<1x32xf32, #tpu.memory_space<vmem>>, %arg4: memref<32x32xf32, #tpu.memory_space<vmem>>, %arg5: memref<1x32xf32, #tpu.memory_space<vmem>>, %arg6: memref<1x16xf32, #tpu.memory_space<vmem>>, %arg7: memref<16x32xf32, #tpu.memory_space<vmem>>, %arg8: memref<1x32xf32, #tpu.memory_space<vmem>>, %arg9: memref<32x32xf32, #tpu.memory_space<vmem>>, %arg10: memref<1x32xf32, #tpu.memory_space<vmem>>, %arg11: memref<4x128xf32, #tpu.memory_space<vmem>>, %arg12: memref<4x128xf32, #tpu.memory_space<vmem>>, %arg13: memref<4x128xf32, #tpu.memory_space<vmem>>) attributes {dimension_semantics = [#tpu.dimension_semantics<parallel>], iteration_bounds = array<i64: 1>, scalar_prefetch = 0 : i64, scratch_operands = 0 : i64, tpu.core_type = #tpu.core_type<tc>, window_params = [{pipeline_mode = #tpu.pipeline_mode<synchronous>, transform_indices = @transform_0, window_bounds = array<i64: 1, 16>}, {pipeline_mode = #tpu.pipeline_mode<synchronous>, transform_indices = @transform_1, window_bounds = array<i64: 16, 32>}, {pipeline_mode = #tpu.pipeline_mode<synchronous>, transform_indices = @transform_2, window_bounds = array<i64: 1, 32>}, {pipeline_mode = #tpu.pipeline_mode<synchronous>, transform_indices = @transform_3, window_bounds = array<i64: 32, 32>}, {pipeline_mode = #tpu.pipeline_mode<synchronous>, transform_indices = @transform_4, window_bounds = array<i64: 1, 32>}, {pipeline_mode = #tpu.pipeline_mode<synchronous>, transform_indices = @transform_5, window_bounds = array<i64: 1, 16>}, {pipeline_mode = #tpu.pipeline_mode<synchronous>, transform_indices = @transform_6, window_bounds = array<i64: 16, 32>}, {pipeline_mode = #tpu.pipeline_mode<synchronous>, transform_indices = @transform_7, window_bounds = array<i64: 1, 32>}, {pipeline_mode = #tpu.pipeline_mode<synchronous>, transform_indices = @transform_8, window_bounds = array<i64: 32, 32>}, {pipeline_mode = #tpu.pipeline_mode<synchronous>, transform_indices = @transform_9, window_bounds = array<i64: 1, 32>}, {transform_indices = @transform_10, window_bounds = array<i64: 4, 128>}, {transform_indices = @transform_11, window_bounds = array<i64: 4, 128>}, {transform_indices = @transform_12, window_bounds = array<i64: 4, 128>}]} {
    %c0 = arith.constant 0 : index
    %c0_0 = arith.constant 0 : index
    %0 = vector.load %arg1[%c0, %c0_0] : memref<1x16xf32, #tpu.memory_space<vmem>>, vector<1x16xf32>
    %c0_1 = arith.constant 0 : index
    %c0_2 = arith.constant 0 : index
    %1 = vector.load %arg2[%c0_1, %c0_2] : memref<16x32xf32, #tpu.memory_space<vmem>>, vector<16x32xf32>
    %c0_3 = arith.constant 0 : index
    %c0_4 = arith.constant 0 : index
    %2 = vector.load %arg3[%c0_3, %c0_4] : memref<1x32xf32, #tpu.memory_space<vmem>>, vector<1x32xf32>
    %c0_5 = arith.constant 0 : index
    %c0_6 = arith.constant 0 : index
    %3 = vector.load %arg4[%c0_5, %c0_6] : memref<32x32xf32, #tpu.memory_space<vmem>>, vector<32x32xf32>
    %c0_7 = arith.constant 0 : index
    %c0_8 = arith.constant 0 : index
    %4 = vector.load %arg5[%c0_7, %c0_8] : memref<1x32xf32, #tpu.memory_space<vmem>>, vector<1x32xf32>
    %5 = vector.shape_cast %0 : vector<1x16xf32> to vector<1x16xf32>
    %6 = vector.broadcast %5 : vector<1x16xf32> to vector<8x16xf32>
    %cst = arith.constant dense<0.000000e+00> : vector<8x32xf32>
    %7 = tpu.matmul %6, %1, %cst {dimension_numbers = #tpu.dot_dimension_numbers<[1], [0], [0], [1], [0, 0, 1, 1], [], []>} : vector<8x16xf32>, vector<16x32xf32>, vector<8x32xf32> -> vector<8x32xf32>
    %8 = vector.broadcast %2 : vector<1x32xf32> to vector<8x32xf32>
    %9 = arith.addf %7, %8 : vector<8x32xf32>
    %cst_9 = arith.constant 0.000000e+00 : f32
    %10 = vector.broadcast %cst_9 : f32 to vector<8x32xf32>
    %11 = arith.maximumf %9, %10 : vector<8x32xf32>
    %cst_10 = arith.constant dense<0.000000e+00> : vector<8x32xf32>
    %12 = tpu.matmul %11, %3, %cst_10 {dimension_numbers = #tpu.dot_dimension_numbers<[1], [0], [0], [1], [0, 0, 1, 1], [], []>} : vector<8x32xf32>, vector<32x32xf32>, vector<8x32xf32> -> vector<8x32xf32>
    %13 = vector.broadcast %4 : vector<1x32xf32> to vector<8x32xf32>
    %14 = arith.addf %12, %13 : vector<8x32xf32>
    %15 = vector.extract_strided_slice %14 {offsets = [0, 0], sizes = [1, 32], strides = [1, 1]} : vector<8x32xf32> to vector<1x32xf32>
    %16 = arith.negf %15 : vector<1x32xf32>
    %17 = math.exp %16 : vector<1x32xf32>
    %cst_11 = arith.constant 1.000000e+00 : f32
    %18 = vector.broadcast %cst_11 : f32 to vector<1x32xf32>
    %19 = arith.addf %18, %17 : vector<1x32xf32>
    %20 = arith.divf %18, %19 : vector<1x32xf32>
    %cst_12 = arith.constant 2.000000e+00 : f32
    %21 = vector.broadcast %cst_12 : f32 to vector<1x32xf32>
    %22 = arith.mulf %20, %21 : vector<1x32xf32>
    %23 = tpu.concatenate %22, %22, %22, %22 in 1 : vector<1x32xf32>, vector<1x32xf32>, vector<1x32xf32>, vector<1x32xf32> -> vector<1x128xf32>
    %c0_13 = arith.constant 0 : index
    %c0_14 = arith.constant 0 : index
    %24 = vector.load %arg6[%c0_13, %c0_14] : memref<1x16xf32, #tpu.memory_space<vmem>>, vector<1x16xf32>
    %c0_15 = arith.constant 0 : index
    %c0_16 = arith.constant 0 : index
    %25 = vector.load %arg7[%c0_15, %c0_16] : memref<16x32xf32, #tpu.memory_space<vmem>>, vector<16x32xf32>
    %c0_17 = arith.constant 0 : index
    %c0_18 = arith.constant 0 : index
    %26 = vector.load %arg8[%c0_17, %c0_18] : memref<1x32xf32, #tpu.memory_space<vmem>>, vector<1x32xf32>
    %c0_19 = arith.constant 0 : index
    %c0_20 = arith.constant 0 : index
    %27 = vector.load %arg9[%c0_19, %c0_20] : memref<32x32xf32, #tpu.memory_space<vmem>>, vector<32x32xf32>
    %c0_21 = arith.constant 0 : index
    %c0_22 = arith.constant 0 : index
    %28 = vector.load %arg10[%c0_21, %c0_22] : memref<1x32xf32, #tpu.memory_space<vmem>>, vector<1x32xf32>
    %29 = vector.shape_cast %24 : vector<1x16xf32> to vector<1x16xf32>
    %30 = vector.broadcast %29 : vector<1x16xf32> to vector<8x16xf32>
    %cst_23 = arith.constant dense<0.000000e+00> : vector<8x32xf32>
    %31 = tpu.matmul %30, %25, %cst_23 {dimension_numbers = #tpu.dot_dimension_numbers<[1], [0], [0], [1], [0, 0, 1, 1], [], []>} : vector<8x16xf32>, vector<16x32xf32>, vector<8x32xf32> -> vector<8x32xf32>
    %32 = vector.broadcast %26 : vector<1x32xf32> to vector<8x32xf32>
    %33 = arith.addf %31, %32 : vector<8x32xf32>
    %cst_24 = arith.constant 0.000000e+00 : f32
    %34 = vector.broadcast %cst_24 : f32 to vector<8x32xf32>
    %35 = arith.maximumf %33, %34 : vector<8x32xf32>
    %cst_25 = arith.constant dense<0.000000e+00> : vector<8x32xf32>
    %36 = tpu.matmul %35, %27, %cst_25 {dimension_numbers = #tpu.dot_dimension_numbers<[1], [0], [0], [1], [0, 0, 1, 1], [], []>} : vector<8x32xf32>, vector<32x32xf32>, vector<8x32xf32> -> vector<8x32xf32>
    %37 = vector.broadcast %28 : vector<1x32xf32> to vector<8x32xf32>
    %38 = arith.addf %36, %37 : vector<8x32xf32>
    %39 = vector.extract_strided_slice %38 {offsets = [0, 0], sizes = [1, 32], strides = [1, 1]} : vector<8x32xf32> to vector<1x32xf32>
    %40 = arith.negf %39 : vector<1x32xf32>
    %41 = math.exp %40 : vector<1x32xf32>
    %cst_26 = arith.constant 1.000000e+00 : f32
    %42 = vector.broadcast %cst_26 : f32 to vector<1x32xf32>
    %43 = arith.addf %42, %41 : vector<1x32xf32>
    %44 = arith.divf %42, %43 : vector<1x32xf32>
    %cst_27 = arith.constant 2.000000e+00 : f32
    %45 = vector.broadcast %cst_27 : f32 to vector<1x32xf32>
    %46 = arith.mulf %44, %45 : vector<1x32xf32>
    %47 = tpu.concatenate %46, %46, %46, %46 in 1 : vector<1x32xf32>, vector<1x32xf32>, vector<1x32xf32>, vector<1x32xf32> -> vector<1x128xf32>
    %c0_28 = arith.constant 0 : index
    %c0_29 = arith.constant 0 : index
    %48 = vector.load %arg11[%c0_28, %c0_29] : memref<4x128xf32, #tpu.memory_space<vmem>>, vector<4x128xf32>
    %49 = vector.broadcast %23 : vector<1x128xf32> to vector<4x128xf32>
    %50 = arith.mulf %48, %49 : vector<4x128xf32>
    %c0_30 = arith.constant 0 : index
    %c0_31 = arith.constant 0 : index
    %51 = vector.load %arg12[%c0_30, %c0_31] : memref<4x128xf32, #tpu.memory_space<vmem>>, vector<4x128xf32>
    tpu.vector_store %arg12[%c0_30, %c0_31], %50 {strides = array<i32>} : memref<4x128xf32, #tpu.memory_space<vmem>>, vector<4x128xf32>,
    %52 = vector.broadcast %47 : vector<1x128xf32> to vector<4x128xf32>
    %53 = arith.mulf %48, %52 : vector<4x128xf32>
    %c0_32 = arith.constant 0 : index
    %c0_33 = arith.constant 0 : index
    %54 = vector.load %arg13[%c0_32, %c0_33] : memref<4x128xf32, #tpu.memory_space<vmem>>, vector<4x128xf32>
    tpu.vector_store %arg13[%c0_32, %c0_33], %53 {strides = array<i32>} : memref<4x128xf32, #tpu.memory_space<vmem>>, vector<4x128xf32>,
    return
  }
  func.func @transform_0(%arg0: i32) -> (i32, i32) {
    %c0_i32 = arith.constant 0 : i32
    %c0_i32_0 = arith.constant 0 : i32
    %c0_i32_1 = arith.constant 0 : i32
    return %c0_i32, %c0_i32_0 : i32, i32
  }
  func.func @transform_1(%arg0: i32) -> (i32, i32) {
    %c0_i32 = arith.constant 0 : i32
    %c0_i32_0 = arith.constant 0 : i32
    %c0_i32_1 = arith.constant 0 : i32
    return %c0_i32, %c0_i32_0 : i32, i32
  }
  func.func @transform_2(%arg0: i32) -> (i32, i32) {
    %c0_i32 = arith.constant 0 : i32
    %c0_i32_0 = arith.constant 0 : i32
    %c0_i32_1 = arith.constant 0 : i32
    return %c0_i32, %c0_i32_0 : i32, i32
  }
  func.func @transform_3(%arg0: i32) -> (i32, i32) {
    %c0_i32 = arith.constant 0 : i32
    %c0_i32_0 = arith.constant 0 : i32
    %c0_i32_1 = arith.constant 0 : i32
    return %c0_i32, %c0_i32_0 : i32, i32
  }
  func.func @transform_4(%arg0: i32) -> (i32, i32) {
    %c0_i32 = arith.constant 0 : i32
    %c0_i32_0 = arith.constant 0 : i32
    %c0_i32_1 = arith.constant 0 : i32
    return %c0_i32, %c0_i32_0 : i32, i32
  }
  func.func @transform_5(%arg0: i32) -> (i32, i32) {
    %c0_i32 = arith.constant 0 : i32
    %c0_i32_0 = arith.constant 0 : i32
    %c0_i32_1 = arith.constant 0 : i32
    return %c0_i32, %c0_i32_0 : i32, i32
  }
  func.func @transform_6(%arg0: i32) -> (i32, i32) {
    %c0_i32 = arith.constant 0 : i32
    %c0_i32_0 = arith.constant 0 : i32
    %c0_i32_1 = arith.constant 0 : i32
    return %c0_i32, %c0_i32_0 : i32, i32
  }
  func.func @transform_7(%arg0: i32) -> (i32, i32) {
    %c0_i32 = arith.constant 0 : i32
    %c0_i32_0 = arith.constant 0 : i32
    %c0_i32_1 = arith.constant 0 : i32
    return %c0_i32, %c0_i32_0 : i32, i32
  }
  func.func @transform_8(%arg0: i32) -> (i32, i32) {
    %c0_i32 = arith.constant 0 : i32
    %c0_i32_0 = arith.constant 0 : i32
    %c0_i32_1 = arith.constant 0 : i32
    return %c0_i32, %c0_i32_0 : i32, i32
  }
  func.func @transform_9(%arg0: i32) -> (i32, i32) {
    %c0_i32 = arith.constant 0 : i32
    %c0_i32_0 = arith.constant 0 : i32
    %c0_i32_1 = arith.constant 0 : i32
    return %c0_i32, %c0_i32_0 : i32, i32
  }
  func.func @transform_10(%arg0: i32) -> (i32, i32) {
    %c0_i32 = arith.constant 0 : i32
    %c0_i32_0 = arith.constant 0 : i32
    return %arg0, %c0_i32 : i32, i32
  }
  func.func @transform_11(%arg0: i32) -> (i32, i32) {
    %c0_i32 = arith.constant 0 : i32
    %c0_i32_0 = arith.constant 0 : i32
    return %arg0, %c0_i32 : i32, i32
  }
  func.func @transform_12(%arg0: i32) -> (i32, i32) {
    %c0_i32 = arith.constant 0 : i32
    %c0_i32_0 = arith.constant 0 : i32
    return %arg0, %c0_i32 : i32, i32
  }
}

</mosaic_0001>

<bundles_post_ra>
// kernel: tpu_custom_call.1
= control target key start
LH: loop header
LB: loop body
LE: loop exit
PB: predicated region body
PF: predicated region fallthrough
CT: control target
= control target key end

     0   :  { %18 = vsyncpa [#allocation3], 0  ;;  %s745_s0 = inlined_call_operand.hbm [shape: f32[1,16], index: 0, kind: input, shape index: {}]   ;;  %s746_s1 = inlined_call_operand.hbm [shape: f32[16,32], index: 1, kind: input, shape index: {}]   ;;  %s747_s2 = inlined_call_operand.vmem [shape: f32[1,32], index: 2, kind: input, shape index: {}]   ;;  %s748_s3 = inlined_call_operand.hbm [shape: f32[32,32], index: 3, kind: input, shape index: {}]   ;;  %s749_s4 = inlined_call_operand.vmem [shape: f32[1,32], index: 4, kind: input, shape index: {}]   ;;  %s750_s5 = inlined_call_operand.vmem [shape: f32[1,16], index: 5, kind: input, shape index: {}]   ;;  %s751_s6 = inlined_call_operand.hbm [shape: f32[16,32], index: 6, kind: input, shape index: {}]   ;;  %s752_s7 = inlined_call_operand.hbm [shape: f32[1,32], index: 7, kind: input, shape index: {}]   ;;  %s753_s8 = inlined_call_operand.hbm [shape: f32[32,32], index: 8, kind: input, shape index: {}]   ;;  %s754_s9 = inlined_call_operand.vmem [shape: f32[1,32], index: 9, kind: input, shape index: {}]   ;;  %s755_s10 = inlined_call_operand.vmem [shape: f32[4,128], index: 10, kind: input, shape index: {}]   ;;  %s756_s11 = inlined_call_operand.hbm [shape: f32[4,128], index: 11, kind: output, shape index: {0}]   ;;  %s757_s12 = inlined_call_operand.hbm [shape: f32[4,128], index: 12, kind: output, shape index: {1}]  }
   0x1   :  { %19 = vsyncpa [#allocation6], 0 }
   0x2   :  { %20 = vsyncpa [#allocation9], 0 }
   0x3   :  { %21 = vsyncpa [#allocation12], 0 }
   0x4   :  { %22 = vsyncpa [#allocation4], 0  ;;  %s39_s23 = sshll.u32 %s746_s1, 4  ;;  %s40_s23 = int_to_ptr.hbm [resolvable:$true] %s39_s23 }
   0x5   :  { %23 = vsyncpa [#allocation15], 0  ;;  %s608_s24 = smov [#allocation5]   ;;  %s71_s28 = sshll.u32 %s751_s6, 4  ;;  %s72_s28 = int_to_ptr.hbm [resolvable:$true] %s71_s28 }
   0x6   :  { %s41_s25 = sshll.u32 %s608_s24, 4  ;;  %s609_s29 = smov 128   ;;  %s42_s25 = int_to_ptr.vmem [resolvable:$true] %s41_s25 }
   0x7   :  { %s610_s30 = smov 8   ;;  %s611_s13 = smov [#allocation8]  }
   0x8   :  { %47 = dma.hbm_to_vmem [thread:$0]  %s40_s23, 256, %s42_s25, [#allocation6], %s609_s29, %s609_s29, %s610_s30  }
   0x9   :  { %s73_s14 = sshll.u32 %s611_s13, 4  ;;  %s29_s16 = sshll.u32 %s745_s0, 4  ;;  %s74_s14 = int_to_ptr.vmem [resolvable:$true] %s73_s14  ;;  %s30_s16 = int_to_ptr.hbm [resolvable:$true] %s29_s16 }
   0xa   :  { %79 = dma.hbm_to_vmem [thread:$0]  %s72_s28, 256, %s74_s14, [#allocation9], %s609_s29, %s609_s29, %s610_s30  }
   0xb   :  { %s54_s18 = sshll.u32 %s748_s3, 4  ;;  %s612_s19 = smov [#allocation2]   ;;  %s55_s18 = int_to_ptr.hbm [resolvable:$true] %s54_s18 }
   0xc   :  { %s31_s20 = sshll.u32 %s612_s19, 4  ;;  %s613_s21 = smov [#allocation7]   ;;  %s32_s20 = int_to_ptr.vmem [resolvable:$true] %s31_s20 }
   0xd   :  { %34 = dma.hbm_to_vmem [thread:$0]  %s30_s16, 16, %s32_s20, [#allocation3]  }
   0xe   :  { %s56_s22 = sshll.u32 %s613_s21, 4  ;;  %s85_s0 = sshll.u32 %s752_s7, 4  ;;  %s57_s22 = int_to_ptr.vmem [resolvable:$true] %s56_s22  ;;  %s86_s0 = int_to_ptr.hbm [resolvable:$true] %s85_s0 }
   0xf   :  { %62 = dma.hbm_to_vmem [thread:$0]  %s55_s18, 512, %s57_s22, [#allocation6], %s609_s29, %s609_s29, %s610_s30  }
  0x10   :  { %s95_s3 = sshll.u32 %s753_s8, 4  ;;  %s614_s27 = smov [#allocation10]   ;;  %s96_s3 = int_to_ptr.hbm [resolvable:$true] %s95_s3 }
  0x11   :  { %s87_s28 = sshll.u32 %s614_s27, 4  ;;  %s615_s13 = smov [#allocation11]   ;;  %s88_s28 = int_to_ptr.vmem [resolvable:$true] %s87_s28 }
  0x12   :  { %90 = dma.hbm_to_vmem [thread:$0]  %s86_s0, 16, %s88_s28, [#allocation9]  }
  0x13   :  { %s97_s14 = sshll.u32 %s615_s13, 4  ;;  %s98_s14 = int_to_ptr.vmem [resolvable:$true] %s97_s14 }
  0x14   :  { %103 = dma.hbm_to_vmem [thread:$0]  %s96_s3, 512, %s98_s14, [#allocation12], %s609_s29, %s609_s29, %s610_s30  }
  0x15   :  { %596 = dma.done.wait [#allocation3], 16  }
  0x16   :  { %597 = vsyncadd [#allocation3], 4294967280 }
  0x17   :  { %598 = dma.done.wait [#allocation6], 768  }
  0x18   :  { %599 = vsyncadd [#allocation6], 4294966528 }
  0x19   :  { %600 = dma.done.wait [#allocation9], 272  }
  0x1a   :  { %601 = vsyncadd [#allocation9], 4294967024 }
  0x1b   :  { %602 = dma.done.wait [#allocation12], 512  }
  0x1c   :  { %603 = vsyncadd [#allocation12], 4294966784  ;;  %v134_v0 = vld [vmem:[#allocation5 + $0x8] sm:$0xff]  ;;  %v234_v1 = vld [vmem:[#allocation8 + $0x8] sm:$0xff]  ;;  %vm146_vm0 = vcmask 130048   ;;  %vm173_vm1 = vcmask 261120  }
  0x1d   :  { %v133_v2 = vld [vmem:[#allocation5] sm:$0xff]  ;;  %163 = vmatpush.msra.mxu0 %v134_v0  ;;  %262 = vmatpush.msra.mxu2 %v234_v1  ;;  %v233_v3 = vld [vmem:[#allocation8] sm:$0xff]  ;;  %v390_v4 = vld [vmem:[#allocation2] ss:$0 sm:$0xff]  ;;  %s618_s16 = smov 32   ;;  %vm228_vm10 = vcmask 523264  }
  0x1e   :  { %v391_v5 = vld [vmem:[%s750_s5] ss:$0 sm:$0xff]  ;;  %v139_v6 = vld [vmem:[#allocation7 + $0x18] sm:$0xff]  ;;  %v138_v7 = vld [vmem:[#allocation7 + $0x10] sm:$0xff]  ;;  %vm230_vm11 = vcmask 785408   ;;  %s619_s18 = smov [#allocation13]  }
  0x1f   :  { %164 = vmatpush.msra.mxu0 %v133_v2  ;;  %263 = vmatpush.msra.mxu2 %v233_v3  ;;  %v137_v8 = vld [vmem:[#allocation7 + $0x8] sm:$0xff]  ;;  %v136_v9 = vld [vmem:[#allocation7] sm:$0xff]  ;;  %v236_v13 = vld [vmem:[#allocation11] sm:$0xff]  ;;  %s340_s19 = sshll.u32 %s619_s18, 4  ;;  %s342_s22 = sshll.u32 %s756_s11, 4  ;;  %s341_s19 = int_to_ptr.vmem [resolvable:$true] %s340_s19  ;;  %s343_s22 = int_to_ptr.hbm [resolvable:$true] %s342_s22 }
  0x20   :  { %371 = vmatmul.msk.f32.vlgmr.msra.gmra.mxu0 %vm146_vm0, %v390_v4  ;;  %374 = vmatmul.msk.f32.vlgmr.msra.gmra.mxu2 %vm146_vm0, %v391_v5  ;;  %v239_v10 = vld [vmem:[#allocation11 + $0x18] sm:$0xff]  ;;  %v238_v11 = vld [vmem:[#allocation11 + $0x10] sm:$0xff]  ;;  %v237_v12 = vld [vmem:[#allocation11 + $0x8] sm:$0xff]  ;;  %s353_s11 = sshll.u32 %s757_s12, 4  ;;  %s354_s11 = int_to_ptr.hbm [resolvable:$true] %s353_s11 }
  0x21   :  { %189 = vmatpush.msra.mxu1 %v139_v6  ;;  %287 = vmatpush.msra.mxu3 %v239_v10  ;;  %v392_v14 = vld [vmem:[%s747_s2] ss:$0 sm:$0xff]  ;;  %v393_v18 = vld [vmem:[#allocation10] ss:$0 sm:$0xff] }
  0x22   :  { %v394_v22 = vld [vmem:[%s749_s4] ss:$0 sm:$0xff]  ;;  %s616_s4 = smov 96  }
  0x23   :  { %190 = vmatpush.msra.mxu1 %v138_v7  ;;  %288 = vmatpush.msra.mxu3 %v238_v11  ;;  %v395_v26 = vld [vmem:[%s754_s9] ss:$0 sm:$0xff]  ;;  %s617_s9 = smov 64  }
  0x24   :  { %v328_v62 = vld [vmem:[%s755_s10] sm:$0xf]  ;;  %s620_s10 = smov [#allocation14]  }
  0x25   :  { %191 = vmatpush.msra.mxu1 %v137_v8  ;;  %289 = vmatpush.msra.mxu3 %v237_v12  ;;  %s351_s23 = sshll.u32 %s620_s10, 4  ;;  %s352_s23 = int_to_ptr.vmem [resolvable:$true] %s351_s23 }
  0x27   :  { %192 = vmatpush.msra.mxu1 %v136_v9  ;;  %290 = vmatpush.msra.mxu3 %v236_v13 }
  0x9d   :  { %v166_v15 = vpop.f32.mrf.mxu0 }
  0x9e   :  { %v167_v16 = vadd.f32 %v392_v14, %v166_v15 }
  0xa0   :  { %v169_v17 = vmax.f32 %v167_v16, 0.0 }
  0xa2   :  { %372 = vmatmul.msk.f32.vlgmr.msra.gmra.mxu1 %vm173_vm1, %v169_v17 }
  0xa3   :  { %v265_v19 = vpop.f32.mrf.mxu2 }
  0xa4   :  { %v266_v20 = vadd.f32 %v393_v18, %v265_v19 }
  0xa6   :  { %v268_v21 = vmax.f32 %v266_v20, 0.0 }
  0xa8   :  { %375 = vmatmul.msk.f32.vlgmr.msra.gmra.mxu3 %vm173_vm1, %v268_v21 }
 0x11f   :  { %v194_v23 = vpop.f32.mrf.mxu1 }
 0x120   :  { %v195_v24 = vadd.f32 %v394_v22, %v194_v23 }
 0x122   :  { %v373_v25 = vmul.f32 -1.442695, %v195_v24 }
 0x124   :  { %396 = vpow2.f32 %v373_v25 }
 0x12a   :  { %v397_v27 = vpop.eup %396 }
 0x12b   :  { %v200_v28 = vadd.f32 1.0, %v397_v27  ;;  %v292_v29 = vpop.f32.mrf.mxu3 }
 0x12c   :  { %v293_v30 = vadd.f32 %v395_v26, %v292_v29 }
 0x12d   :  { %398 = vrcp.f32 %v200_v28  ;;  %v212_v37 = vand.u32 2147483648, %v200_v28  ;;  %v210_v39 = vand.u32 2147483647, %v200_v28  ;;  %vm206_vm3 = vweird.f32 %v200_v28 }
 0x12e   :  { %v376_v31 = vmul.f32 -1.442695, %v293_v30 }
 0x12f   :  { %v213_v41 = vor.u32 1.1754944e-38, %v212_v37  ;;  %vm211_vm5 = vcmp.eq.f32.partialorder %v210_v39, 8.507059e+37 }
 0x130   :  { %400 = vpow2.f32 %v376_v31 }
 0x133   :  { %v399_v32 = vpop.eup %398 }
 0x134   :  { %v202_v33 = vmul.f32 %v399_v32, %v200_v28  ;;  %vm207_vm2 = vweird.f32 %v399_v32 }
 0x135   :  { %vm208_vm4 = vmor %vm206_vm3, %vm207_vm2 }
 0x136   :  { %v401_v34 = vpop.eup %400  ;;  %v203_v35 = vsub.f32 1.0, %v202_v33 }
 0x137   :  { %v298_v36 = vadd.f32 1.0, %v401_v34 }
 0x138   :  { %v204_v38 = vmul.f32 %v399_v32, %v203_v35 }
 0x139   :  { %402 = vrcp.f32 %v298_v36  ;;  %v310_v48 = vand.u32 2147483648, %v298_v36  ;;  %v308_v50 = vand.u32 2147483647, %v298_v36  ;;  %vm304_vm7 = vweird.f32 %v298_v36 }
 0x13a   :  { %v205_v40 = vadd.f32 %v399_v32, %v204_v38 }
 0x13b   :  { %v311_v52 = vor.u32 1.1754944e-38, %v310_v48  ;;  %vm309_vm9 = vcmp.eq.f32.partialorder %v308_v50, 8.507059e+37 }
 0x13c   :  { %v209_v42 = vsel %vm208_vm4, %v399_v32, %v205_v40 }
 0x13d   :  { %v214_v43 = vsel %vm211_vm5, %v213_v41, %v209_v42 }
 0x13e   :  { %v216_v44 = vmul.f32 2.0, %v214_v43 }
 0x13f   :  { %v403_v45 = vpop.eup %402 }
 0x140   :  { %v300_v46 = vmul.f32 %v403_v45, %v298_v36  ;;  %224 = vrot.lane.b32.xlu2 %v216_v44, %s616_s4  ;;  %221 = vrot.lane.b32.xlu1 %v216_v44, %s617_s9  ;;  %vm305_vm6 = vweird.f32 %v403_v45 }
 0x141   :  { %218 = vrot.lane.b32.xlu0 %v216_v44, %s618_s16  ;;  %vm306_vm8 = vmor %vm304_vm7, %vm305_vm6 }
 0x142   :  { %v301_v47 = vsub.f32 1.0, %v300_v46 }
 0x144   :  { %v302_v49 = vmul.f32 %v403_v45, %v301_v47 }
 0x146   :  { %v303_v51 = vadd.f32 %v403_v45, %v302_v49 }
 0x148   :  { %v307_v53 = vsel %vm306_vm8, %v403_v45, %v303_v51 }
 0x149   :  { %v312_v54 = vsel %vm309_vm9, %v311_v52, %v307_v53 }
 0x14a   :  { %v314_v55 = vmul.f32 2.0, %v312_v54 }
 0x14c   :  { %322 = vrot.lane.b32.xlu2 %v314_v55, %s616_s4  ;;  %319 = vrot.lane.b32.xlu1 %v314_v55, %s617_s9 }
 0x14d   :  { %316 = vrot.lane.b32.xlu0 %v314_v55, %s618_s16 }
 0x19a   :  { %v225_v59 = vpop.permute.xlu2 %224 }
 0x1a6   :  { %v323_v4 = vpop.permute.xlu2 %322 }
 0x1b2   :  { %v222_v56 = vpop.permute.xlu1 %221 }
 0x1b3   :  { %v219_v57 = vpop.permute.xlu0 %218 }
 0x1b4   :  { %v227_v58 = vsel %vm173_vm1, %v216_v44, %v219_v57 }
 0x1b5   :  { %v229_v60 = vsel %vm228_vm10, %v227_v58, %v222_v56 }
 0x1b6   :  { %v231_v61 = vsel %vm230_vm11, %v229_v60, %v225_v59 }
 0x1b7   :  { %v329_v63 = vperm.slane %v231_v61, 0 }
 0x1b9   :  { %v330_v0 = vmul.f32 %v329_v63, %v328_v62 }
 0x1bb   :  { %331 = vst [vmem:[#allocation13] sm:$0xf] %v330_v0 }
 0x1bc   :  { %345 = dma.vmem_to_hbm [thread:$0]  %s341_s19, 64, %s343_s22, [#allocation4]  }
 0x1be   :  { %v320_v1 = vpop.permute.xlu1 %319 }
 0x1bf   :  { %v317_v2 = vpop.permute.xlu0 %316 }
 0x1c0   :  { %v325_v3 = vsel %vm173_vm1, %v314_v55, %v317_v2 }
 0x1c1   :  { %v326_v5 = vsel %vm228_vm10, %v325_v3, %v320_v1 }
 0x1c2   :  { %v327_v6 = vsel %vm230_vm11, %v326_v5, %v323_v4 }
 0x1c3   :  { %v332_v7 = vperm.slane %v327_v6, 0 }
 0x1c5   :  { %v333_v8 = vmul.f32 %v332_v7, %v328_v62 }
 0x1c7   :  { %334 = vst [vmem:[#allocation14] sm:$0xf] %v333_v8 }
 0x1c8   :  { %356 = dma.vmem_to_hbm [thread:$0]  %s352_s23, 64, %s354_s11, [#allocation15]  }
 0x1c9   :  { %604 = dma.done.wait [#allocation4], 64  }
 0x1ca   :  { %605 = vsyncadd [#allocation4], 4294967232 }
 0x1cb   :  { %606 = dma.done.wait [#allocation15], 64  }
 0x1cc   :  { %607 = vsyncadd [#allocation15], 4294967232 }
 0x1cd   :  { %365 = vsyncpa [#allocation3], 1 }
 0x1ce   :  { %366 = vsyncpa [#allocation6], 1 }
 0x1cf   :  { %367 = vsyncpa [#allocation9], 1 }
 0x1d0   :  { %368 = vsyncpa [#allocation12], 1 }
 0x1d1   :  { %369 = vsyncpa [#allocation4], 1 }
 0x1d2   :  { %370 = vsyncpa [#allocation15], 1 }

</bundles_post_ra>
